<compile_context>
chip_gen: v7x
topology: tpu7x:2x2x1
jax: 0.10.0
libtpu: 0.0.40
codegen_flags: <defaults>
</compile_context>

<pallas_src>
import jax
import jax.numpy as jnp
from jax import lax
from jax.experimental import pallas as pl
from jax.experimental.pallas import tpu as pltpu

LANE = 128
SUBLANE = 8
_LO_BLOCK = 1 << 20      # target at least ~1 MiB per x block
_HI_BLOCK = 4 << 20      # ... and at most ~4 MiB


def _round_up(x, m):
    return (x + m - 1) // m * m


def _vmem_params():
    """Generation-aware (vmem_limit_bytes, tile-sizing budget)."""
    phys = 64 * 1024 * 1024                      # conservative default (v7x: 64 MiB/TC)
    try:
        info = pltpu.get_tpu_info()
        phys = int(getattr(info, "vmem_capacity_bytes", phys))
    except Exception:
        pass
    if phys < (16 << 20):                        # guard against bogus readings
        phys = 64 * 1024 * 1024
    limit = min((phys * 3) // 4, 96 * 1024 * 1024)   # 48 MiB on v7x, 96 MiB on v5e/v6e
    budget = max(limit - (8 << 20), (limit * 3) // 4)
    return limit, budget


def _norm_hw_tile(ht, hw):
    """hw_tile must be a multiple of 128 (multi-block) or the full H*W (one block)."""
    if ht >= hw:
        return hw
    ht = max(LANE, (ht // LANE) * LANE)
    return hw if ht >= hw else ht


def _pick_tiles(n, c, hw, x_itemsize, fixed_bytes, budget):
    """Footprint-driven (n_tile, hw_tile): grow hw_tile first toward a 1-4 MiB
    input block, then n_tile; keep double-buffered x + accumulator + the fixed
    (weight/bias/output) blocks under the VMEM budget."""
    hw_pad = _round_up(hw, LANE)
    # batch-tile candidates: the full batch or multiples of 8 (keeps the
    # (n_tile, c2_pad) output block (8,128)-legal); for N >= 16 cap near N/2 so
    # the "parallel" batch axis has >= 2 grid steps (v7x megacore).
    if n <= 8:
        cands = [n]
    else:
        cap = n if n < 16 else max(8, ((n + 1) // 2) // 8 * 8)
        cands = list(range(8, min(cap, n) + 1, 8))
        if n <= cap and n not in cands:
            cands.append(n)
    nt = cands[0]
    row = max(1, c * x_itemsize)                              # bytes per hw element
    ht = min(hw_pad, _round_up(max(LANE, _HI_BLOCK // (nt * row)), LANE))
    if ht >= hw_pad:                          # whole H*W in one step -> grow n_tile
        ht = hw_pad
        for m in cands:
            if m * row * ht > _HI_BLOCK and m != cands[0]:
                break
            nt = m
            if nt * row * ht >= _LO_BLOCK:
                break

    def footprint(m, t):
        return (2 * m * c * t * x_itemsize    # double-buffered x block
                + m * c * LANE * 4            # f32 lane-shaped accumulator
                + fixed_bytes(m))             # weight / bias / output blocks

    while footprint(nt, ht) > budget and nt > cands[0]:
        nt = cands[cands.index(nt) - 1]
    while footprint(nt, ht) > budget and ht > LANE:
        ht = max(LANE, _round_up(ht // 2, LANE))
    return nt, _norm_hw_tile(ht, hw)


# ----------------------------------------------------------------------------
# Kernel bodies
# ----------------------------------------------------------------------------
def _accumulate_full_chunks(x_ref, acc_ref, hw, hw_tile):
    """Accumulate the full 128-lane chunks of the current HW block into the
    lane-shaped f32 accumulator (VALU-only; one chunk live at a time)."""
    num_hw = -(-hw // hw_tile)
    rem = hw - (num_hw - 1) * hw_tile          # valid lanes in the last block
    chunks_body = hw_tile // LANE              # full chunks in a non-last block
    chunks_last = rem // LANE                  # full chunks in the last block
    step = pl.program_id(1)
    last = pl.num_programs(1) - 1

    @pl.when(step == 0)
    def _init():
        acc_ref[...] = jnp.zeros_like(acc_ref)

    def accum(n_chunks):
        if n_chunks == 0:
            return

        def body(k, a):
            off = pl.multiple_of(k * LANE, LANE)
            return a + x_ref[:, :, pl.ds(off, LANE)].astype(jnp.float32)

        acc_ref[...] = lax.fori_loop(0, n_chunks, body, acc_ref[...],
                                     unroll=min(n_chunks, 8))

    if chunks_body == chunks_last:
        accum(chunks_body)
    else:
        @pl.when(step != last)
        def _full_block():
            accum(chunks_body)

        @pl.when(step == last)
        def _last_block():
            accum(chunks_last)


def _lane_sum_with_leftover(x_ref, acc_ref, hw, hw_tile):
    """(Last HW step only.)  One XLU cross-lane reduce of the accumulator plus
    the sub-128-lane leftover of the last block; returns the f32 channel SUM."""
    z = jnp.sum(acc_ref[...], axis=-1)                         # (n_tile, C) f32
    num_hw = -(-hw // hw_tile)
    rem = hw - (num_hw - 1) * hw_tile
    lo = (rem // LANE) * LANE
    lw = rem - lo
    if lw > 0:
        tail = x_ref[:, :, lo:lo + lw].astype(jnp.float32)     # real data only
        z = z + jnp.sum(tail, axis=-1)
    return z


def _make_fused_kernel(hw, hw_tile):
    """Global-average-pool + 1x1 conv (MXU) + bias, fused (single-tensor path)."""
    inv_hw = 1.0 / float(hw)

    def kernel(x_ref, w_ref, b_ref, o_ref, acc_ref):
        _accumulate_full_chunks(x_ref, acc_ref, hw, hw_tile)

        @pl.when(pl.program_id(1) == pl.num_programs(1) - 1)
        def _finalize():
            z = _lane_sum_with_leftover(x_ref, acc_ref, hw, hw_tile) * inv_hw
            out = jnp.dot(z.astype(w_ref.dtype), w_ref[...],
                          preferred_element_type=jnp.float32) + b_ref[...]
            o_ref[...] = out.astype(o_ref.dtype)

    return kernel


def _make_pool_kernel(hw, hw_tile):
    """Global-average-pool only (per-tensor path for list inputs)."""
    inv_hw = 1.0 / float(hw)

    def kernel(x_ref, o_ref, acc_ref):
        _accumulate_full_chunks(x_ref, acc_ref, hw, hw_tile)

        @pl.when(pl.program_id(1) == pl.num_programs(1) - 1)
        def _finalize():
            o_ref[...] = _lane_sum_with_leftover(x_ref, acc_ref, hw, hw_tile) * inv_hw

    return kernel


def _linear_kernel(z_ref, w_ref, b_ref, o_ref):
    out = jnp.dot(z_ref[...].astype(w_ref.dtype), w_ref[...],
                  preferred_element_type=jnp.float32) + b_ref[...]
    o_ref[...] = out.astype(o_ref.dtype)


# ----------------------------------------------------------------------------
# Wrappers
# ----------------------------------------------------------------------------
def _pool_conv_fused(x4, w_t, bias, c2_pad, out_dtype, hw_tile, n_tile,
                     vmem_limit, vmem_budget):
    n, c, h, w = (int(s) for s in x4.shape)
    hw = h * w
    x3 = x4.reshape(n, c, hw)                  # trailing-dim merge: no HBM copy
    x_itemsize = jnp.dtype(x4.dtype).itemsize
    w_itemsize = jnp.dtype(w_t.dtype).itemsize
    o_itemsize = jnp.dtype(out_dtype).itemsize

    def fixed(m):
        return (2 * c * c2_pad * w_itemsize    # weight block (conservatively x2)
                + 2 * c2_pad * 4               # bias block
                + 2 * m * c2_pad * o_itemsize)  # output block

    nt, ht = _pick_tiles(n, c, hw, x_itemsize, fixed, vmem_budget)
    if hw_tile is not None:
        ht = _norm_hw_tile(int(hw_tile), hw)
    if n_tile is not None:
        nt = int(n_tile)
    grid = (-(-n // nt), -(-hw // ht))

    # pad only the small operands: lane-dense (unmasked) output stores need c2_pad
    w_p = jnp.pad(w_t, ((0, 0), (0, c2_pad - w_t.shape[1])))
    b_p = jnp.pad(bias.astype(jnp.float32).reshape(1, -1),
                  ((0, 0), (0, c2_pad - bias.shape[0])))

    cost = pl.CostEstimate(
        flops=int(n * c * hw + 2 * n * c * c2_pad),
        transcendentals=0,
        bytes_accessed=int(n * c * hw * x_itemsize
                           + c * c2_pad * w_itemsize + n * c2_pad * o_itemsize))

    return pl.pallas_call(
        _make_fused_kernel(hw, ht),
        out_shape=jax.ShapeDtypeStruct((n, c2_pad), out_dtype),
        grid=grid,
        in_specs=[
            pl.BlockSpec((nt, c, ht), lambda i, hh: (i, 0, hh)),
            pl.BlockSpec((c, c2_pad), lambda i, hh: (0, 0)),
            pl.BlockSpec((1, c2_pad), lambda i, hh: (0, 0)),
        ],
        out_specs=pl.BlockSpec((nt, c2_pad), lambda i, hh: (i, 0)),
        scratch_shapes=[pltpu.VMEM((nt, c, LANE), jnp.float32)],
        compiler_params=pltpu.CompilerParams(
            dimension_semantics=("parallel", "arbitrary"),
            vmem_limit_bytes=vmem_limit),
        cost_estimate=cost,
    )(x3, w_p, b_p)


def _pool_mean(x4, hw_tile, n_tile, vmem_limit, vmem_budget):
    n, c, h, w = (int(s) for s in x4.shape)
    hw = h * w
    x3 = x4.reshape(n, c, hw)
    x_itemsize = jnp.dtype(x4.dtype).itemsize

    nt, ht = _pick_tiles(n, c, hw, x_itemsize, lambda m: 2 * m * c * 4, vmem_budget)
    if hw_tile is not None:
        ht = _norm_hw_tile(int(hw_tile), hw)
    if n_tile is not None:
        nt = int(n_tile)
    grid = (-(-n // nt), -(-hw // ht))

    cost = pl.CostEstimate(flops=int(n * c * hw), transcendentals=0,
                           bytes_accessed=int(n * c * hw * x_itemsize + n * c * 4))

    return pl.pallas_call(
        _make_pool_kernel(hw, ht),
        out_shape=jax.ShapeDtypeStruct((n, c), jnp.float32),
        grid=grid,
        in_specs=[pl.BlockSpec((nt, c, ht), lambda i, hh: (i, 0, hh))],
        out_specs=pl.BlockSpec((nt, c), lambda i, hh: (i, 0)),
        scratch_shapes=[pltpu.VMEM((nt, c, LANE), jnp.float32)],
        compiler_params=pltpu.CompilerParams(
            dimension_semantics=("parallel", "arbitrary"),
            vmem_limit_bytes=vmem_limit),
        cost_estimate=cost,
    )(x3)


def _linear(z, w_t, bias, out_dtype, vmem_limit):
    n, c1 = (int(s) for s in z.shape)
    c2 = int(w_t.shape[1])
    return pl.pallas_call(
        _linear_kernel,
        out_shape=jax.ShapeDtypeStruct((n, c2), out_dtype),
        compiler_params=pltpu.CompilerParams(vmem_limit_bytes=vmem_limit),
    )(z, w_t, bias.astype(jnp.float32).reshape(1, c2))


def classify_forward(x, weight, bias, *, hw_tile=None, n_tile=None):
    """Global-average-pool + 1x1 conv + flatten (the Classify head).

    x      : (N, C, H, W) array, or a list of such arrays (channels concatenated
             after per-tensor pooling, like torch.cat([Pool(y) for y in x], 1)).
    weight : (c2, c1, 1, 1) conv weight (PyTorch layout), c1 = sum of channels.
    bias   : (c2,) conv bias.
    returns: (N, c2)
    """
    xs = list(x) if isinstance(x, (list, tuple)) else [x]
    c2, c1 = int(weight.shape[0]), int(weight.shape[1])
    assert sum(int(t.shape[1]) for t in xs) == c1, "channel mismatch with conv weight"
    out_dtype = xs[0].dtype
    vmem_limit, vmem_budget = _vmem_params()
    w_t = weight.reshape(c2, c1).T                                  # (c1, c2)

    if len(xs) == 1:
        c2_pad = _round_up(c2, LANE)
        out = _pool_conv_fused(xs[0], w_t, bias, c2_pad, out_dtype,
                               hw_tile, n_tile, vmem_limit, vmem_budget)
        return out[:, :c2]

    # list input: pool each tensor in its own kernel (no HBM concat/pad of the
    # activations), concatenate only the tiny (N, C_i) pooled means, then run
    # the 1x1-conv matmul as a small kernel.
    zs = [_pool_mean(t, hw_tile, n_tile, vmem_limit, vmem_budget) for t in xs]
    z = jnp.concatenate(zs, axis=1)                                 # (N, c1) f32 (tiny)
    return _linear(z, w_t, bias, out_dtype, vmem_limit)


if __name__ == "__main__":
    # Small shapes consistent with Classify(c1=4, c2=8, k=1)
    N, C1, H, W = 2, 4, 16, 16
    C2 = 8

    key = jax.random.PRNGKey(0)
    kx, kw, kb, kx2, kx3 = jax.random.split(key, 5)
    x = jax.random.normal(kx, (N, C1, H, W), dtype=jnp.float32)
    weight = jax.random.normal(kw, (C2, C1, 1, 1), dtype=jnp.float32) * 0.1
    bias = jax.random.normal(kb, (C2,), dtype=jnp.float32) * 0.1
    ref = jnp.mean(x, axis=(2, 3)) @ weight.reshape(C2, C1).T + bias

    # Auto-tiled path (single HW step).
    out_auto = jax.block_until_ready(classify_forward(x, weight, bias))
    assert out_auto.shape == (N, C2)
    assert jnp.allclose(out_auto, ref, atol=1e-4, rtol=1e-4)

    # hw_tile=128 -> 2 reduction steps: exercises init / accumulate / finalize.
    out = jax.block_until_ready(classify_forward(x, weight, bias, hw_tile=128))
    assert jnp.allclose(out, ref, atol=1e-4, rtol=1e-4)

    # Ragged H*W (10*20 = 200, not a multiple of 128) with 2 HW steps:
    # exercises the in-kernel leftover-lane reduction (no host-side padding).
    xr = jax.random.normal(kx3, (N, C1, 10, 20), dtype=jnp.float32)
    outr = jax.block_until_ready(classify_forward(xr, weight, bias, hw_tile=128))
    refr = jnp.mean(xr, axis=(2, 3)) @ weight.reshape(C2, C1).T + bias
    assert jnp.allclose(outr, refr, atol=1e-4, rtol=1e-4)

    # List input with different spatial sizes: per-tensor pooling kernels plus
    # one small 1x1-conv matmul kernel (no big HBM concat/pad of activations).
    x2 = jax.random.normal(kx2, (N, C1, 8, 8), dtype=jnp.float32)
    kw2, kb2 = jax.random.split(kw, 2)
    weight2 = jax.random.normal(kw2, (C2, 2 * C1, 1, 1), dtype=jnp.float32) * 0.1
    bias2 = jax.random.normal(kb2, (C2,), dtype=jnp.float32) * 0.1
    out2 = jax.block_until_ready(classify_forward([x, x2], weight2, bias2))
    z2 = jnp.concatenate([jnp.mean(x, axis=(2, 3)), jnp.mean(x2, axis=(2, 3))], axis=1)
    ref2 = z2 @ weight2.reshape(C2, 2 * C1).T + bias2
    assert out2.shape == (N, C2)
    assert jnp.allclose(out2, ref2, atol=1e-4, rtol=1e-4)

    print("KERNEL_OK")
</pallas_src>

<mosaic_0001>
module attributes {stable_mosaic.version = 11 : i64} {
  func.func @kernel(%arg0: i32, %arg1: i32, %arg2: memref<2x4x256xf32, #tpu.memory_space<vmem>>, %arg3: memref<4x128xf32, #tpu.memory_space<vmem>>, %arg4: memref<1x128xf32, #tpu.memory_space<vmem>>, %arg5: memref<2x128xf32, #tpu.memory_space<vmem>>, %arg6: memref<2x4x128xf32, #tpu.memory_space<vmem>>) attributes {dimension_semantics = [#tpu.dimension_semantics<parallel>, #tpu.dimension_semantics<arbitrary>], iteration_bounds = array<i64: 1, 1>, scalar_prefetch = 0 : i64, scratch_operands = 1 : i64, tpu.core_type = #tpu.core_type<tc>, window_params = [{transform_indices = @transform_0, window_bounds = array<i64: 2, 4, 256>}, {pipeline_mode = #tpu.pipeline_mode<synchronous>, transform_indices = @transform_1, window_bounds = array<i64: 4, 128>}, {pipeline_mode = #tpu.pipeline_mode<synchronous>, transform_indices = @transform_2, window_bounds = array<i64: 1, 128>}, {transform_indices = @transform_3, window_bounds = array<i64: 2, 128>}]} {
    %c0_i32 = arith.constant 0 : i32
    %0 = arith.cmpi eq, %arg1, %c0_i32 : i32
    %1 = arith.extui %0 : i1 to i32
    %c0_i32_0 = arith.constant 0 : i32
    %2 = arith.cmpi ne, %1, %c0_i32_0 : i32
    scf.if %2 {
      %cst = arith.constant 0.000000e+00 : f32
      %18 = vector.broadcast %cst : f32 to vector<2x4x128xf32>
      %c0_14 = arith.constant 0 : index
      %c0_15 = arith.constant 0 : index
      %c0_16 = arith.constant 0 : index
      %19 = vector.load %arg6[%c0_14, %c0_15, %c0_16] : memref<2x4x128xf32, #tpu.memory_space<vmem>>, vector<2x4x128xf32>
      tpu.vector_store %arg6[%c0_14, %c0_15, %c0_16], %18 {strides = array<i32>} : memref<2x4x128xf32, #tpu.memory_space<vmem>>, vector<2x4x128xf32>,
    } else {
    }
    %c0 = arith.constant 0 : index
    %c0_1 = arith.constant 0 : index
    %c0_2 = arith.constant 0 : index
    %3 = vector.load %arg6[%c0, %c0_1, %c0_2] : memref<2x4x128xf32, #tpu.memory_space<vmem>>, vector<2x4x128xf32>
    %c0_i32_3 = arith.constant 0 : i32
    %c128_i32 = arith.constant 128 : i32
    %4 = arith.muli %c0_i32_3, %c128_i32 : i32
    %5 = tpu.assume_multiple %4, 128 : i32
    %c0_4 = arith.constant 0 : index
    %c0_5 = arith.constant 0 : index
    %6 = arith.index_cast %5 : i32 to index
    %7 = vector.load %arg2[%c0_4, %c0_5, %6] : memref<2x4x256xf32, #tpu.memory_space<vmem>>, vector<2x4x128xf32>
    %8 = arith.addf %3, %7 : vector<2x4x128xf32>
    %c1_i32 = arith.constant 1 : i32
    %c128_i32_6 = arith.constant 128 : i32
    %9 = arith.muli %c1_i32, %c128_i32_6 : i32
    %10 = tpu.assume_multiple %9, 128 : i32
    %c0_7 = arith.constant 0 : index
    %c0_8 = arith.constant 0 : index
    %11 = arith.index_cast %10 : i32 to index
    %12 = vector.load %arg2[%c0_7, %c0_8, %11] : memref<2x4x256xf32, #tpu.memory_space<vmem>>, vector<2x4x128xf32>
    %13 = arith.addf %8, %12 : vector<2x4x128xf32>
    %c2_i32 = arith.constant 2 : i32
    %c0_9 = arith.constant 0 : index
    %c0_10 = arith.constant 0 : index
    %c0_11 = arith.constant 0 : index
    %14 = vector.load %arg6[%c0_9, %c0_10, %c0_11] : memref<2x4x128xf32, #tpu.memory_space<vmem>>, vector<2x4x128xf32>
    tpu.vector_store %arg6[%c0_9, %c0_10, %c0_11], %13 {strides = array<i32>} : memref<2x4x128xf32, #tpu.memory_space<vmem>>, vector<2x4x128xf32>,
    %c0_i32_12 = arith.constant 0 : i32
    %15 = arith.cmpi eq, %arg1, %c0_i32_12 : i32
    %16 = arith.extui %15 : i1 to i32
    %c0_i32_13 = arith.constant 0 : i32
    %17 = arith.cmpi ne, %16, %c0_i32_13 : i32
    scf.if %17 {
      %c0_14 = arith.constant 0 : index
      %c0_15 = arith.constant 0 : index
      %c0_16 = arith.constant 0 : index
      %18 = vector.load %arg6[%c0_14, %c0_15, %c0_16] : memref<2x4x128xf32, #tpu.memory_space<vmem>>, vector<2x4x128xf32>
      %cst = arith.constant dense<0.000000e+00> : vector<2x4xf32>
      %19 = vector.multi_reduction <add>, %18, %cst [2] : vector<2x4x128xf32> to vector<2x4xf32>
      %cst_17 = arith.constant 3.906250e-03 : f32
      %20 = vector.broadcast %cst_17 : f32 to vector<2x4xf32>
      %21 = arith.mulf %19, %20 : vector<2x4xf32>
      %c0_18 = arith.constant 0 : index
      %c0_19 = arith.constant 0 : index
      %22 = vector.load %arg3[%c0_18, %c0_19] : memref<4x128xf32, #tpu.memory_space<vmem>>, vector<4x128xf32>
      %cst_20 = arith.constant dense<0.000000e+00> : vector<2x128xf32>
      %23 = tpu.matmul %21, %22, %cst_20 {dimension_numbers = #tpu.dot_dimension_numbers<[1], [0], [0], [1], [0, 0, 1, 1], [], []>} : vector<2x4xf32>, vector<4x128xf32>, vector<2x128xf32> -> vector<2x128xf32>
      %c0_21 = arith.constant 0 : index
      %c0_22 = arith.constant 0 : index
      %24 = vector.load %arg4[%c0_21, %c0_22] : memref<1x128xf32, #tpu.memory_space<vmem>>, vector<1x128xf32>
      %25 = vector.broadcast %24 : vector<1x128xf32> to vector<2x128xf32>
      %26 = arith.addf %23, %25 : vector<2x128xf32>
      %c0_23 = arith.constant 0 : index
      %c0_24 = arith.constant 0 : index
      %27 = vector.load %arg5[%c0_23, %c0_24] : memref<2x128xf32, #tpu.memory_space<vmem>>, vector<2x128xf32>
      tpu.vector_store %arg5[%c0_23, %c0_24], %26 {strides = array<i32>} : memref<2x128xf32, #tpu.memory_space<vmem>>, vector<2x128xf32>,
    } else {
    }
    return
  }
  func.func @transform_0(%arg0: i32, %arg1: i32) -> (i32, i32, i32) {
    %c0_i32 = arith.constant 0 : i32
    %c0_i32_0 = arith.constant 0 : i32
    return %arg0, %c0_i32, %arg1 : i32, i32, i32
  }
  func.func @transform_1(%arg0: i32, %arg1: i32) -> (i32, i32) {
    %c0_i32 = arith.constant 0 : i32
    %c0_i32_0 = arith.constant 0 : i32
    %c0_i32_1 = arith.constant 0 : i32
    return %c0_i32, %c0_i32_0 : i32, i32
  }
  func.func @transform_2(%arg0: i32, %arg1: i32) -> (i32, i32) {
    %c0_i32 = arith.constant 0 : i32
    %c0_i32_0 = arith.constant 0 : i32
    %c0_i32_1 = arith.constant 0 : i32
    return %c0_i32, %c0_i32_0 : i32, i32
  }
  func.func @transform_3(%arg0: i32, %arg1: i32) -> (i32, i32) {
    %c0_i32 = arith.constant 0 : i32
    %c0_i32_0 = arith.constant 0 : i32
    return %arg0, %c0_i32 : i32, i32
  }
}

</mosaic_0001>

<bundles_post_ra>
// kernel: tpu_custom_call.1
= control target key start
LH: loop header
LB: loop body
LE: loop exit
PB: predicated region body
PF: predicated region fallthrough
CT: control target
= control target key end

     0   :  { %8 = vsyncpa [#allocation4], 0  ;;  %s344_s0 = inlined_call_operand.hbm [shape: f32[2,4,256], index: 0, kind: input, shape index: {}]   ;;  %s345_s1 = inlined_call_operand.hbm [shape: f32[4,128], index: 1, kind: input, shape index: {}]   ;;  %s346_s2 = inlined_call_operand.vmem [shape: f32[1,128], index: 2, kind: input, shape index: {}]   ;;  %s347_s3 = inlined_call_operand.hbm [shape: f32[2,128], index: 3, kind: output, shape index: {}]  }
   0x1   :  { %9 = vsyncpa [#allocation7], 0 }
   0x2   :  { %10 = vsyncpa [#allocation5], 0  ;;  %s278_s12 = smov [#allocation3]   ;;  %s206_s16 = scalar_lea.hbm %s344_s0, 256 }
   0x3   :  { %s16_s13 = sshll.u32 %s278_s12, 4  ;;  %p207_p0 = scmp.ne.s32.totalorder %s344_s0, %s206_s16  ;;  %s17_s13 = int_to_ptr.vmem [resolvable:$true] %s16_s13 }
   0x4   :  { %p210_p1 = scmp.lt.u32.totalorder %s206_s16, %s344_s0 }
   0x6   :  { %p212_p2 = pnand %p210_p1, %p207_p0 }
   0x8   :  { %215 = shalt.err (!%p212_p2)
}
   0x9   :  { %s216_s21 = scalar_lea.vmem %s17_s13, 256  ;;  %p221_p4 = scmp.lt.s32.totalorder %s17_s13, %s17_s13 }
   0xa   :  { %p217_p3 = scmp.ne.s32.totalorder %s17_s13, %s216_s21  ;;  %p222_p5 = scmp.lt.s32.totalorder %s216_s21, %s216_s21 }
   0xc   :  { %p223_p6 = por %p222_p5, %p221_p4 }
   0xe   :  { %p224_p7 = pnand %p223_p6, %p217_p3 }
  0x10   :  { %227 = shalt.err (!%p224_p7)
}
  0x11   :  { %s279_s22 = smov 128   ;;  %s280_s23 = smov 8  }
  0x12   :  { %22 = dma.hbm_to_vmem [thread:$0]  %s344_s0, 256, %s17_s13, [#allocation4], %s279_s22, %s279_s22, %s280_s23  }
  0x13   :  { %s281_s26 = smov [#allocation6]   ;;  %s228_s30 = scalar_lea.hbm %s345_s1, 64 }
  0x14   :  { %s29_s27 = sshll.u32 %s281_s26, 4  ;;  %p229_p8 = scmp.ne.s32.totalorder %s345_s1, %s228_s30  ;;  %s30_s27 = int_to_ptr.vmem [resolvable:$true] %s29_s27 }
  0x15   :  { %p232_p9 = scmp.lt.u32.totalorder %s228_s30, %s345_s1 }
  0x17   :  { %p234_p10 = pnand %p232_p9, %p229_p8 }
  0x19   :  { %237 = shalt.err (!%p234_p10)
}
  0x1a   :  { %s238_s8 = scalar_lea.vmem %s30_s27, 64  ;;  %p243_p12 = scmp.lt.s32.totalorder %s30_s27, %s30_s27 }
  0x1b   :  { %p239_p11 = scmp.ne.s32.totalorder %s30_s27, %s238_s8  ;;  %p244_p13 = scmp.lt.s32.totalorder %s238_s8, %s238_s8 }
  0x1d   :  { %p245_p0 = por %p244_p13, %p243_p12 }
  0x1f   :  { %p246_p1 = pnand %p245_p0, %p239_p11 }
  0x21   :  { %249 = shalt.err (!%p246_p1)
}
  0x22   :  { %32 = dma.hbm_to_vmem [thread:$0]  %s345_s1, 64, %s30_s27, [#allocation7]  }
  0x23   :  { %272 = dma.done.wait [#allocation4], 256  }
  0x24   :  { %273 = vsyncadd [#allocation4], 4294967040 }
  0x25   :  { %274 = dma.done.wait [#allocation7], 64  }
  0x26   :  { %275 = vsyncadd [#allocation7], 4294967232  ;;  %v282_v0 = vmov 0.0   ;;  %v49_v1 = vld [vmem:[#allocation3] sm:$0xf]  ;;  %vm65_vm0 = vcmask 1043456   ;;  %v84_v16 = vlaneseq }
  0x27   :  { %45 = vst [vmem:[#allocation2] sm:$0xf] %v282_v0  ;;  %46 = vst [vmem:[#allocation2 + $0x4] sm:$0xf] %v282_v0  ;;  %194 = vmatprep.subr.mxu0 %v282_v0  ;;  %v54_v2 = vld [vmem:[#allocation3 + $0x4] sm:$0xf] }
  0x28   :  { %v50_v3 = vld [vmem:[#allocation3 + $0x8] sm:$0xf]  ;;  %v55_v6 = vld [vmem:[#allocation3 + $0xc] sm:$0xf]  ;;  %v74_v15 = vld [vmem:[#allocation6] sm:$0xf] }
  0x29   :  { %195 = vmatpush3.msk.msra.mxu0 %vm65_vm0, %v74_v15  ;;  %vm283_vm1 = vmmov 0   ;;  %v85_v17 = vand.u32 127, %v84_v16  ;;  %v87_v18 = vshrl.u32 %v84_v16, 7  ;;  %vm94_vm2 = vcmask 1041409   ;;  %v189_v27 = vld [vmem:[%s346_s2] ss:$0 sm:$0xff] }
  0x2a   :  { %196 = vmatprep.mubr.msk.f32.mxu0 %vm283_vm1, %v282_v0  ;;  %vm96_vm3 = vcmask 31744   ;;  %s284_s11 = smov [#allocation8]  }
  0x2b   :  { %v88_v20 = vsub.s32 %v85_v17, %v87_v18  ;;  %s179_s12 = sshll.u32 %s284_s11, 4  ;;  %s180_s12 = int_to_ptr.vmem [resolvable:$true] %s179_s12 }
  0x2c   :  { %s250_s13 = scalar_lea.vmem %s180_s12, 32  ;;  %p255_p3 = scmp.lt.s32.totalorder %s180_s12, %s180_s12 }
  0x2d   :  { %p251_p2 = scmp.ne.s32.totalorder %s180_s12, %s250_s13  ;;  %p256_p4 = scmp.lt.s32.totalorder %s250_s13, %s250_s13 }
  0x2e   :  { %v47_v4 = vld [vmem:[#allocation2] sm:$0xf]  ;;  %v48_v5 = vld [vmem:[#allocation2 + $0x4] sm:$0xf] }
  0x2f   :  { %v51_v7 = vadd.f32 %v49_v1, %v47_v4  ;;  %v52_v8 = vadd.f32 %v50_v3, %v48_v5  ;;  %p257_p5 = por %p256_p4, %p255_p3 }
  0x31   :  { %v56_v9 = vadd.f32 %v54_v2, %v51_v7  ;;  %v57_v10 = vadd.f32 %v55_v6, %v52_v8  ;;  %p258_p6 = pnand %p257_p5, %p251_p2 }
  0x33   :  { %58 = vst [vmem:[#allocation2] sm:$0xf] %v56_v9  ;;  %59 = vst [vmem:[#allocation2 + $0x4] sm:$0xf] %v57_v10 }
  0x3a   :  { %v63_v11 = vld [vmem:[#allocation2] sm:$0xf]  ;;  %v64_v12 = vld [vmem:[#allocation2 + $0x4] sm:$0xf] }
  0x3b   :  { %v66_v13 = vsel %vm65_vm0, %v63_v11, 0.0  ;;  %v69_v14 = vsel %vm65_vm0, %v64_v12, 0.0 }
  0x3c   :  { %67 = vadd.xlane.f32.xlu0 %v66_v13 }
  0x40   :  { %70 = vadd.xlane.f32.xlu0 %v69_v14 }
  0xc9   :  { %v68_v19 = vpop.xlane.xlu0 %67 }
  0xca   :  { %v72_v21 = vmul.f32 0.00390625, %v68_v19 }
  0xcc   :  { %v89_v24 = vrot.slane %v72_v21, %v88_v20 }
  0xcd   :  { %v71_v22 = vpop.xlane.xlu0 %70 }
  0xce   :  { %v73_v23 = vmul.f32 0.00390625, %v71_v22 }
  0xd0   :  { %v93_v25 = vrot.slane %v73_v23, %v88_v20 }
  0xd2   :  { %v95_v26 = vsel %vm94_vm2, %v93_v25, %v89_v24 }
  0xd3   :  { %197 = vmatmul.mubr.msk.f32.vlgmr.msra.gmra.mrb[0].mxu0 %vm96_vm3, %v95_v26 }
 0x1a6   :  { %v168_v28 = vpop.f32.mrb[0].mxu0 }
 0x1a7   :  { %v169_v29 = vadd.f32 %v189_v27, %v168_v28  ;;  %v198_v30 = vpop.f32.mrb[1].mxu0 }
 0x1a9   :  { %172 = vst [vmem:[#allocation8] sm:$0x3] %v169_v29 }
 0x1aa   :  { %261 = shalt.err (!%p258_p6)
}
 0x1ab   :  { %s262_s16 = scalar_lea.hbm %s347_s3, 32 }
 0x1ac   :  { %p263_p7 = scmp.ne.s32.totalorder %s347_s3, %s262_s16  ;;  %p266_p8 = scmp.lt.u32.totalorder %s262_s16, %s347_s3 }
 0x1ae   :  { %p268_p9 = pnand %p266_p8, %p263_p7 }
 0x1b0   :  { %271 = shalt.err (!%p268_p9)
}
 0x1b1   :  { %182 = dma.vmem_to_hbm [thread:$0]  %s180_s12, 32, %s347_s3, [#allocation5]  }
 0x1b2   :  { %276 = dma.done.wait [#allocation5], 32  }
 0x1b3   :  { %277 = vsyncadd [#allocation5], 4294967264 }
 0x1b4   :  { %186 = vsyncpa [#allocation4], 1 }
 0x1b5   :  { %187 = vsyncpa [#allocation7], 1 }
 0x1b6   :  { %188 = vsyncpa [#allocation5], 1 }

</bundles_post_ra>
